<compile_context>
chip_gen: v5e
topology: v5e:2x2
jax: 0.10.0
libtpu: 0.0.40
codegen_flags: <defaults>
</compile_context>

<pallas_src>
import jax
import jax.numpy as jnp
from jax.experimental import pallas as pl
from jax.experimental.pallas import tpu as pltpu


def _mlp_kernel(x_ref, w1t_ref, b1_ref, w2t_ref, b2_ref, w3t_ref, b3_ref, out_ref):
    x = x_ref[...]                                           # (tb, D)
    # Layer 1: (H1, D) . (tb, D)^T -> (H1, tb)  (trans_b handled by the MXU)
    h = jax.lax.dot_general(
        w1t_ref[...], x, (((1,), (1,)), ((), ())),
        preferred_element_type=jnp.float32)
    h = jnp.maximum(h + b1_ref[...], 0.0)
    # Layer 2: (H2, H1) @ (H1, tb) -> (H2, tb)
    h = jnp.dot(w2t_ref[...], h, preferred_element_type=jnp.float32)
    h = jnp.maximum(h + b2_ref[...], 0.0)
    # Head: (1, H2) @ (H2, tb) -> (1, tb); scalar bias read from SMEM.
    o = jnp.dot(w3t_ref[...], h, preferred_element_type=jnp.float32) + b3_ref[0]
    out_ref[...] = o.astype(out_ref.dtype)                   # lane-dense row store


def _round_up(x, m):
    return (x + m - 1) // m * m


def _choose_batch_tile(B, D, w_bytes, x_itemsize):
    """Largest lane-aligned batch tile whose two double-buffered x tiles plus
    the resident (transposed) weights stay inside a ~40 MiB VMEM budget
    (safe on all generations, including v7x's 64 MiB physical VMEM)."""
    # TODO(synk): for very large flattened obs dims (2*128*D*4 B > ~40 MiB),
    # add a K-tiling grid axis over D with an f32 accumulator scratch.
    budget = max((40 << 20) - w_bytes, 2 * 128 * D * x_itemsize)
    tb = min(2048, budget // (2 * D * x_itemsize))
    if B > 256:
        # Keep >= 2 grid steps so both v7x TensorCores get a share of the batch.
        tb = min(tb, -(-B // 2))
    tb = max(128, tb - tb % 128)
    if B <= tb:
        # Whole batch in one tile; round to 128 lanes (unmasked stores) when
        # the batch is big enough, else just to the 8-sublane granule.
        return _round_up(B, 128) if B >= 128 else _round_up(B, 8)
    return tb


def basic_potential_mlp(state, params, *, compute_dtype=jnp.float32):
    """Forward pass of BasicPotentialMLP.

    Args:
      state: (B, ...) observation batch (trailing dims are flattened).
      params: dict with w1 (D,H1), b1 (1,H1), w2 (H1,H2), b2 (1,H2),
              w3 (H2,1), b3 (1,1).
      compute_dtype: dtype for x / weights in the matmuls (f32 accumulation
        always). jnp.bfloat16 halves x HBM traffic on v5e/v6e/v7x.
    Returns:
      (B,) potential values (squeeze_output=True).
    """
    B = state.shape[0]
    x = state.reshape(B, -1).astype(compute_dtype)           # Flatten layer (glue)
    D = x.shape[1]
    H1 = params["w1"].shape[1]
    H2 = params["w2"].shape[1]

    # Batch-on-lanes layout: transposed weights, column biases, scalar b3.
    w1t = params["w1"].T.astype(compute_dtype)               # (H1, D)
    w2t = params["w2"].T.astype(compute_dtype)               # (H2, H1)
    w3t = params["w3"].T.astype(compute_dtype)               # (1,  H2)
    b1 = params["b1"].reshape(H1, 1).astype(jnp.float32)
    b2 = params["b2"].reshape(H2, 1).astype(jnp.float32)
    b3 = params["b3"].reshape(1).astype(jnp.float32)         # -> SMEM scalar

    itemsize = jnp.dtype(compute_dtype).itemsize
    w_bytes = itemsize * (D * H1 + H1 * H2 + H2) + 4 * (H1 + H2 + 1)
    tb = _choose_batch_tile(B, D, w_bytes, itemsize)
    B_pad = _round_up(B, tb)
    if B_pad != B:
        x = jnp.pad(x, ((0, B_pad - B), (0, 0)))
    n_tiles = B_pad // tb

    cost = pl.CostEstimate(
        flops=2 * B_pad * (D * H1 + H1 * H2 + H2),
        transcendentals=0,
        bytes_accessed=(itemsize * (B_pad * D + D * H1 + H1 * H2 + H2)
                        + 4 * (B_pad + H1 + H2 + 1)),
    )

    out = pl.pallas_call(
        _mlp_kernel,
        out_shape=jax.ShapeDtypeStruct((1, B_pad), jnp.float32),
        grid_spec=pltpu.PrefetchScalarGridSpec(
            num_scalar_prefetch=0,
            grid=(n_tiles,),
            in_specs=[
                pl.BlockSpec((tb, D), lambda i: (i, 0)),     # x batch tile
                pl.BlockSpec((H1, D), lambda i: (0, 0)),     # w1^T (resident)
                pl.BlockSpec((H1, 1), lambda i: (0, 0)),     # b1
                pl.BlockSpec((H2, H1), lambda i: (0, 0)),    # w2^T
                pl.BlockSpec((H2, 1), lambda i: (0, 0)),     # b2
                pl.BlockSpec((1, H2), lambda i: (0, 0)),     # w3^T
                pl.BlockSpec(memory_space=pltpu.MemorySpace.SMEM),  # b3 scalar
            ],
            out_specs=pl.BlockSpec((1, tb), lambda i: (0, i)),
        ),
        compiler_params=pltpu.CompilerParams(
            dimension_semantics=("parallel",),
            vmem_limit_bytes=48 << 20,
        ),
        cost_estimate=cost,
    )(x, w1t, b1, w2t, b2, w3t, b3)

    return out[0, :B]                                        # squeeze_output=True


def init_params(key, in_size, hid_sizes=(32, 32)):
    """Deterministic synthetic init (PyTorch-default-like uniform ranges)."""
    sizes = [in_size] + list(hid_sizes) + [1]
    params = {}
    for idx, (fan_in, fan_out) in enumerate(zip(sizes[:-1], sizes[1:]), start=1):
        key, kw, kb = jax.random.split(key, 3)
        bound = 1.0 / jnp.sqrt(float(fan_in))
        params[f"w{idx}"] = jax.random.uniform(
            kw, (fan_in, fan_out), jnp.float32, -bound, bound)
        params[f"b{idx}"] = jax.random.uniform(
            kb, (1, fan_out), jnp.float32, -bound, bound)
    return params


def _reference(state, params):
    x = state.reshape(state.shape[0], -1).astype(jnp.float32)
    h = jnp.maximum(x @ params["w1"] + params["b1"], 0.0)
    h = jnp.maximum(h @ params["w2"] + params["b2"], 0.0)
    return (h @ params["w3"] + params["b3"])[:, 0]


if __name__ == "__main__":
    key = jax.random.PRNGKey(0)
    k_x1, k_x2, k_p = jax.random.split(key, 3)

    OBS_SHAPE, HID = (4, 4), (32, 32)        # flattened obs dim = 16
    OBS_DIM = 16
    params = init_params(k_p, OBS_DIM, HID)

    fwd = jax.jit(basic_potential_mlp)

    # Small batch: single padded tile, (4,4) obs exercises the Flatten glue.
    s1 = jax.random.normal(k_x1, (8,) + OBS_SHAPE, jnp.float32)
    o1 = jax.block_until_ready(fwd(s1, params))
    r1 = _reference(s1, params)
    assert o1.shape == (8,), o1.shape
    assert jnp.allclose(o1, r1, atol=1e-4, rtol=1e-4), (o1, r1)

    # Ragged batch > 256: exercises the multi-tile grid + zero padding path.
    s2 = jax.random.normal(k_x2, (300,) + OBS_SHAPE, jnp.float32)
    o2 = jax.block_until_ready(fwd(s2, params))
    r2 = _reference(s2, params)
    assert o2.shape == (300,), o2.shape
    assert jnp.allclose(o2, r2, atol=1e-4, rtol=1e-4), (o2, r2)

    print("KERNEL_OK")
</pallas_src>

<mosaic_0001>
module attributes {stable_mosaic.version = 11 : i64} {
  func.func @_mlp_kernel(%arg0: i32, %arg1: memref<8x16xf32, #tpu.memory_space<vmem>>, %arg2: memref<32x16xf32, #tpu.memory_space<vmem>>, %arg3: memref<32x1xf32, #tpu.memory_space<vmem>>, %arg4: memref<32x32xf32, #tpu.memory_space<vmem>>, %arg5: memref<32x1xf32, #tpu.memory_space<vmem>>, %arg6: memref<1x32xf32, #tpu.memory_space<vmem>>, %arg7: memref<1xf32, #tpu.memory_space<smem>>, %arg8: memref<1x8xf32, #tpu.memory_space<vmem>>) attributes {dimension_semantics = [#tpu.dimension_semantics<parallel>], iteration_bounds = array<i64: 1>, scalar_prefetch = 0 : i64, scratch_operands = 0 : i64, tpu.core_type = #tpu.core_type<tc>, window_params = [{transform_indices = @transform_0, window_bounds = array<i64: 8, 16>}, {pipeline_mode = #tpu.pipeline_mode<synchronous>, transform_indices = @transform_1, window_bounds = array<i64: 32, 16>}, {pipeline_mode = #tpu.pipeline_mode<synchronous>, transform_indices = @transform_2, window_bounds = array<i64: 32, 1>}, {pipeline_mode = #tpu.pipeline_mode<synchronous>, transform_indices = @transform_3, window_bounds = array<i64: 32, 32>}, {pipeline_mode = #tpu.pipeline_mode<synchronous>, transform_indices = @transform_4, window_bounds = array<i64: 32, 1>}, {pipeline_mode = #tpu.pipeline_mode<synchronous>, transform_indices = @transform_5, window_bounds = array<i64: 1, 32>}, {transform_indices = @transform_6, window_bounds = array<i64: 1>}, {transform_indices = @transform_7, window_bounds = array<i64: 1, 8>}]} {
    %c0 = arith.constant 0 : index
    %c0_0 = arith.constant 0 : index
    %0 = vector.load %arg1[%c0, %c0_0] : memref<8x16xf32, #tpu.memory_space<vmem>>, vector<8x16xf32>
    %c0_1 = arith.constant 0 : index
    %c0_2 = arith.constant 0 : index
    %1 = vector.load %arg2[%c0_1, %c0_2] : memref<32x16xf32, #tpu.memory_space<vmem>>, vector<32x16xf32>
    %cst = arith.constant dense<0.000000e+00> : vector<32x8xf32>
    %2 = tpu.matmul %1, %0, %cst {dimension_numbers = #tpu.dot_dimension_numbers<[1], [1], [0], [0], [0, 0, 1, 0], [], []>} : vector<32x16xf32>, vector<8x16xf32>, vector<32x8xf32> -> vector<32x8xf32>
    %c0_3 = arith.constant 0 : index
    %c0_4 = arith.constant 0 : index
    %3 = vector.load %arg3[%c0_3, %c0_4] : memref<32x1xf32, #tpu.memory_space<vmem>>, vector<32x1xf32>
    %4 = vector.broadcast %3 : vector<32x1xf32> to vector<32x8xf32>
    %5 = arith.addf %2, %4 : vector<32x8xf32>
    %cst_5 = arith.constant 0.000000e+00 : f32
    %6 = vector.broadcast %cst_5 : f32 to vector<32x8xf32>
    %7 = arith.maximumf %5, %6 : vector<32x8xf32>
    %c0_6 = arith.constant 0 : index
    %c0_7 = arith.constant 0 : index
    %8 = vector.load %arg4[%c0_6, %c0_7] : memref<32x32xf32, #tpu.memory_space<vmem>>, vector<32x32xf32>
    %cst_8 = arith.constant dense<0.000000e+00> : vector<32x8xf32>
    %9 = tpu.matmul %8, %7, %cst_8 {dimension_numbers = #tpu.dot_dimension_numbers<[1], [0], [0], [1], [0, 0, 1, 1], [], []>} : vector<32x32xf32>, vector<32x8xf32>, vector<32x8xf32> -> vector<32x8xf32>
    %c0_9 = arith.constant 0 : index
    %c0_10 = arith.constant 0 : index
    %10 = vector.load %arg5[%c0_9, %c0_10] : memref<32x1xf32, #tpu.memory_space<vmem>>, vector<32x1xf32>
    %11 = vector.broadcast %10 : vector<32x1xf32> to vector<32x8xf32>
    %12 = arith.addf %9, %11 : vector<32x8xf32>
    %cst_11 = arith.constant 0.000000e+00 : f32
    %13 = vector.broadcast %cst_11 : f32 to vector<32x8xf32>
    %14 = arith.maximumf %12, %13 : vector<32x8xf32>
    %c0_12 = arith.constant 0 : index
    %c0_13 = arith.constant 0 : index
    %15 = vector.load %arg6[%c0_12, %c0_13] : memref<1x32xf32, #tpu.memory_space<vmem>>, vector<1x32xf32>
    %cst_14 = arith.constant dense<0.000000e+00> : vector<1x8xf32>
    %16 = tpu.matmul %15, %14, %cst_14 {dimension_numbers = #tpu.dot_dimension_numbers<[1], [0], [0], [1], [0, 0, 1, 1], [], []>} : vector<1x32xf32>, vector<32x8xf32>, vector<1x8xf32> -> vector<1x8xf32>
    %c0_15 = arith.constant 0 : index
    %17 = memref.load %arg7[%c0_15] : memref<1xf32, #tpu.memory_space<smem>>
    %18 = vector.broadcast %17 : f32 to vector<1x8xf32>
    %19 = arith.addf %16, %18 : vector<1x8xf32>
    %c0_16 = arith.constant 0 : index
    %c0_17 = arith.constant 0 : index
    %20 = vector.load %arg8[%c0_16, %c0_17] : memref<1x8xf32, #tpu.memory_space<vmem>>, vector<1x8xf32>
    tpu.vector_store %arg8[%c0_16, %c0_17], %19 {strides = array<i32>} : memref<1x8xf32, #tpu.memory_space<vmem>>, vector<1x8xf32>,
    return
  }
  func.func @transform_0(%arg0: i32) -> (i32, i32) {
    %c0_i32 = arith.constant 0 : i32
    %c0_i32_0 = arith.constant 0 : i32
    return %arg0, %c0_i32 : i32, i32
  }
  func.func @transform_1(%arg0: i32) -> (i32, i32) {
    %c0_i32 = arith.constant 0 : i32
    %c0_i32_0 = arith.constant 0 : i32
    %c0_i32_1 = arith.constant 0 : i32
    return %c0_i32, %c0_i32_0 : i32, i32
  }
  func.func @transform_2(%arg0: i32) -> (i32, i32) {
    %c0_i32 = arith.constant 0 : i32
    %c0_i32_0 = arith.constant 0 : i32
    %c0_i32_1 = arith.constant 0 : i32
    return %c0_i32, %c0_i32_0 : i32, i32
  }
  func.func @transform_3(%arg0: i32) -> (i32, i32) {
    %c0_i32 = arith.constant 0 : i32
    %c0_i32_0 = arith.constant 0 : i32
    %c0_i32_1 = arith.constant 0 : i32
    return %c0_i32, %c0_i32_0 : i32, i32
  }
  func.func @transform_4(%arg0: i32) -> (i32, i32) {
    %c0_i32 = arith.constant 0 : i32
    %c0_i32_0 = arith.constant 0 : i32
    %c0_i32_1 = arith.constant 0 : i32
    return %c0_i32, %c0_i32_0 : i32, i32
  }
  func.func @transform_5(%arg0: i32) -> (i32, i32) {
    %c0_i32 = arith.constant 0 : i32
    %c0_i32_0 = arith.constant 0 : i32
    %c0_i32_1 = arith.constant 0 : i32
    return %c0_i32, %c0_i32_0 : i32, i32
  }
  func.func @transform_6(%arg0: i32) -> i32 {
    %c0_i32 = arith.constant 0 : i32
    %c0_i32_0 = arith.constant 0 : i32
    return %c0_i32 : i32
  }
  func.func @transform_7(%arg0: i32) -> (i32, i32) {
    %c0_i32 = arith.constant 0 : i32
    %c0_i32_0 = arith.constant 0 : i32
    return %c0_i32, %arg0 : i32, i32
  }
}

</mosaic_0001>

<bundles_post_ra>
// kernel: basic_potential_mlp.1
= control target key start
LH: loop header
LB: loop body
LE: loop exit
PB: predicated region body
PF: predicated region fallthrough
CT: control target
= control target key end

     0   :  { %vm57_vm0 = vcmask 130048   ;;  %v274_v3 = vmov 0   ;;  %s387_s0 = inlined_call_operand.vmem [shape: f32[8,16], index: 0, kind: input, shape index: {}]   ;;  %s388_s1 = inlined_call_operand.vmem [shape: f32[32,16], index: 1, kind: input, shape index: {}]   ;;  %s389_s2 = inlined_call_operand.vmem [shape: f32[32,1], index: 2, kind: input, shape index: {}]   ;;  %s390_s3 = inlined_call_operand.vmem [shape: f32[32,32], index: 3, kind: input, shape index: {}]   ;;  %s391_s4 = inlined_call_operand.vmem [shape: f32[32,1], index: 4, kind: input, shape index: {}]   ;;  %s392_s5 = inlined_call_operand.vmem [shape: f32[1,32], index: 5, kind: input, shape index: {}]   ;;  %s393_s6 = inlined_call_operand.<no memory space> [shape: f32[1], index: 6, kind: input, shape index: {}]   ;;  %s394_s7 = inlined_call_operand.hbm [shape: f32[1,8], index: 7, kind: output, shape index: {}]  }
   0x1   :  { %v28_v0 = vld [vmem:[%s387_s0] sm:$0xff]  ;;  %v36_v1 = vld [vmem:[%s389_s2 + $0x18] sm:$0xff]  ;;  %246 = vset.pattern.permute.xlu1 %v274_v3  ;;  %v34_v4 = vld [vmem:[%s389_s2 + $0x8] sm:$0xff]  ;;  %245 = vset.pattern.permute.xlu0 %v274_v3 }
   0x2   :  { %224 = vmatpush.xpose.msk.msra.mxu0 %vm57_vm0, %v28_v0  ;;  %v29_v2 = vld [vmem:[%s388_s1] sm:$0xff]  ;;  %44 = vperm.xlu1 %246, %v34_v4   ;;  %v32_v5 = vld [vmem:[%s388_s1 + $0x18] sm:$0xff] }
   0x3   :  { %54 = vperm.xlu0 %245, %v36_v1   ;;  %234 = vmatpush.xpose.msk.msra.mxu1 %vm57_vm0, %v28_v0 }
   0x4   :  { %13 = vsyncpa [#allocation4], 0  ;;  %247 = vset.pattern.permute.xlu2 %v274_v3  ;;  %v33_v6 = vld [vmem:[%s389_s2] sm:$0xff]  ;;  %v35_v7 = vld [vmem:[%s389_s2 + $0x10] sm:$0xff]  ;;  %vm134_vm1 = vcmask 261120   ;;  %v182_v51 = vstv %s393_s6  ;;  %s275_s10 = smov [#allocation3]  }
   0x5   :  { %225 = vmatmul.msk.f32.vlgmr.msra.gmra.mxu0 %vm57_vm0, %v29_v2  ;;  %v30_v8 = vld [vmem:[%s388_s1 + $0x8] sm:$0xff]  ;;  %v110_v9 = vld [vmem:[%s391_s4] sm:$0xff]  ;;  %v31_v11 = vld [vmem:[%s388_s1 + $0x10] sm:$0xff]  ;;  %s213_s11 = sshll.u32 %s275_s10, 4  ;;  %s215_s14 = sshll.u32 %s394_s7, 4  ;;  %vm206_vm2 = vcmask 57344   ;;  %s214_s11 = int_to_ptr.vmem [resolvable:$true] %s213_s11  ;;  %s216_s14 = int_to_ptr.hbm [resolvable:$true] %s215_s14 }
   0x6   :  { %228 = vmatmul.msk.f32.vlgmr.msra.gmra.mxu1 %vm57_vm0, %v32_v5  ;;  %v111_v10 = vld [vmem:[%s391_s4 + $0x8] sm:$0xff]  ;;  %v113_v16 = vld [vmem:[%s391_s4 + $0x18] sm:$0xff]  ;;  %v112_v20 = vld [vmem:[%s391_s4 + $0x10] sm:$0xff] }
   0x7   :  { %131 = vperm.xlu2 %247, %v113_v16   ;;  %v106_v30 = vld [vmem:[%s390_s3] sm:$0xff]  ;;  %v107_v31 = vld [vmem:[%s390_s3 + $0x8] sm:$0xff]  ;;  %v108_v32 = vld [vmem:[%s390_s3 + $0x10] sm:$0xff] }
   0x8   :  { %v109_v33 = vld [vmem:[%s390_s3 + $0x18] sm:$0xff]  ;;  %v180_v50 = vld [vmem:[%s392_s5] sm:$0x1] }
   0xa   :  { %39 = vperm.xlu1 %246, %v33_v6  }
   0xb   :  { %49 = vperm.xlu0 %245, %v35_v7  }
   0xd   :  { %226 = vmatmul.msk.f32.gmra.mxu0 %vm57_vm0, %v30_v8 }
   0xf   :  { %126 = vperm.xlu2 %247, %v112_v20  }
  0x12   :  { %116 = vperm.xlu1 %246, %v110_v9  }
  0x13   :  { %121 = vperm.xlu0 %245, %v111_v10  }
  0x15   :  { %227 = vmatmul.msk.f32.gmra.mxu0 %vm57_vm0, %v31_v11 }
  0x61   :  { %v132_v34 = vpop.permute.xlu2 %131 }
  0x69   :  { %v127_v36 = vpop.permute.xlu2 %126 }
  0x74   :  { %v45_v17 = vpop.permute.xlu1 %44 }
  0x75   :  { %v55_v13 = vpop.permute.xlu0 %54 }
  0x7c   :  { %v40_v21 = vpop.permute.xlu1 %39 }
  0x7d   :  { %v50_v22 = vpop.permute.xlu0 %49 }
  0x82   :  { %v90_v12 = vpop.f32.mrf.mxu0 }
  0x83   :  { %v99_v14 = vpop.f32.mrf.mxu1  ;;  %v91_v26 = vadd.f32 %v90_v12, %v40_v21 }
  0x84   :  { %v100_v15 = vadd.f32 %v99_v14, %v55_v13  ;;  %v117_v45 = vpop.permute.xlu1 %116 }
  0x85   :  { %v102_v29 = vmax.f32 %v91_v26, 0.0  ;;  %v122_v41 = vpop.permute.xlu0 %121 }
  0x86   :  { %v105_v18 = vmax.f32 %v100_v15, 0.0 }
  0x88   :  { %159 = vmatpush.msrb.mxu1 %v105_v18  ;;  %235 = vmatpush.msra.mxu2 %v105_v18 }
  0x89   :  { %236 = vmatpush.msra.mxu3 %v105_v18 }
  0x8a   :  { %v93_v19 = vpop.f32.mrf.mxu0 }
  0x8b   :  { %v94_v24 = vadd.f32 %v93_v19, %v45_v17 }
  0x8d   :  { %v103_v28 = vmax.f32 %v94_v24, 0.0 }
  0x92   :  { %v96_v23 = vpop.f32.mrf.mxu0 }
  0x93   :  { %v97_v25 = vadd.f32 %v96_v23, %v50_v22 }
  0x95   :  { %v104_v27 = vmax.f32 %v97_v25, 0.0 }
  0x97   :  { %160 = vmatpush.msrb.mxu1 %v104_v27  ;;  %237 = vmatpush.msra.mxu2 %v104_v27 }
  0x98   :  { %238 = vmatpush.msra.mxu3 %v104_v27 }
  0x99   :  { %161 = vmatpush.msrb.mxu1 %v103_v28  ;;  %239 = vmatpush.msra.mxu2 %v103_v28 }
  0x9a   :  { %240 = vmatpush.msra.mxu3 %v103_v28 }
  0x9b   :  { %162 = vmatpush.msrb.mxu1 %v102_v29  ;;  %241 = vmatpush.msra.mxu2 %v102_v29 }
  0x9c   :  { %242 = vmatpush.msra.mxu3 %v102_v29  ;;  %229 = vmatmul.msk.f32.vlgmr.msrb.gmra.mxu1 %vm134_vm1, %v106_v30 }
  0x9d   :  { %230 = vmatmul.msk.f32.vlgmr.msra.gmra.mxu2 %vm134_vm1, %v107_v31  ;;  %231 = vmatmul.msk.f32.vlgmr.msra.gmra.mxu3 %vm134_vm1, %v108_v32 }
  0xa5   :  { %232 = vmatmul.msk.f32.gmra.mxu3 %vm134_vm1, %v109_v33 }
 0x119   :  { %v164_v42 = vpop.f32.mrf.mxu1 }
 0x11a   :  { %v165_v46 = vadd.f32 %v164_v42, %v117_v45 }
 0x11c   :  { %v176_v49 = vmax.f32 %v165_v46, 0.0 }
 0x120   :  { %v170_v35 = vpop.f32.mrf.mxu3  ;;  %v167_v37 = vpop.f32.mrf.mxu2 }
 0x121   :  { %v171_v39 = vadd.f32 %v170_v35, %v127_v36  ;;  %v168_v43 = vadd.f32 %v167_v37, %v122_v41 }
 0x123   :  { %v178_v47 = vmax.f32 %v171_v39, 0.0  ;;  %v177_v48 = vmax.f32 %v168_v43, 0.0 }
 0x128   :  { %v173_v38 = vpop.f32.mrf.mxu3 }
 0x129   :  { %v174_v40 = vadd.f32 %v173_v38, %v132_v34 }
 0x12b   :  { %v179_v44 = vmax.f32 %v174_v40, 0.0 }
 0x12d   :  { %198 = vmatpush.msrb.mxu2 %v179_v44 }
 0x12f   :  { %199 = vmatpush.msrb.mxu2 %v178_v47 }
 0x131   :  { %200 = vmatpush.msrb.mxu2 %v177_v48 }
 0x133   :  { %201 = vmatpush.msrb.mxu2 %v176_v49 }
 0x134   :  { %233 = vmatmul.msk.f32.vlgmr.msrb.gmra.mxu2 %vm134_vm1, %v180_v50 }
 0x1b7   :  { %v203_v52 = vpop.f32.mrf.mxu2 }
 0x1b8   :  { %v204_v53 = vadd.f32 %v203_v52, %v182_v51 }
 0x1ba   :  { %207 = vst.msk [vmem:[#allocation3] sm:$0x1] %vm206_vm2, %v204_v53 }
 0x1bb   :  { %218 = dma.vmem_to_hbm [thread:$0]  %s214_s11, 16, %s216_s14, [#allocation4]  }
 0x1bc   :  { %272 = dma.done.wait [#allocation4], 16  }
 0x1bd   :  { %273 = vsyncadd [#allocation4], 4294967280 }
 0x1be   :  { %223 = vsyncpa [#allocation4], 1 }

</bundles_post_ra>
